<compile_context>
chip_gen: v7x
topology: tpu7x:2x2x1
jax: 0.10.0
libtpu: 0.0.40
codegen_flags: <defaults>
</compile_context>

<pallas_src>
import math

import numpy as np
import jax
import jax.numpy as jnp
from jax import lax
from jax.experimental import pallas as pl
from jax.experimental.pallas import tpu as pltpu

FG_DIM = 133     # functional-group feature dim (hard-coded in the reference)
ATTN_DIM = 32    # attention inner dim (hard-coded in the reference)
LANE = 128       # TPU lane width
ATTN_PAD = 128   # attention dims padded to one full lane group
FGP = ((FG_DIM + LANE - 1) // LANE) * LANE   # 256


def _round_up(n, m):
    return ((n + m - 1) // m) * m


def _pad_to(a, shape):
    pads = [(0, t - s) for s, t in zip(a.shape, shape)]
    if all(p == (0, 0) for p in pads):
        return a
    return jnp.pad(a, pads)


# ----------------------------------------------------------------------------
# Pallas kernels
# ----------------------------------------------------------------------------
def _linear_kernel(x_ref, w_ref, b_ref, o_ref, acc_ref):
    """o = x @ W + b, K-axis accumulated in an f32 VMEM scratch."""
    @pl.when(pl.program_id(2) == 0)
    def _():
        acc_ref[...] = jnp.zeros_like(acc_ref)

    acc_ref[...] += jnp.dot(x_ref[...], w_ref[...],
                            preferred_element_type=jnp.float32)

    @pl.when(pl.program_id(2) == pl.num_programs(2) - 1)
    def _():
        o_ref[...] = acc_ref[...] + b_ref[...]


def _attn_prologue_kernel(fg_ref, init_ref, wq_ref, bq_ref, wkv_ref, bkv_ref,
                          q_out_ref, kv_out_ref, pm_out_ref):
    """Computed ONCE per row (not per query tile):
         q  = fg @ Wq_p  + bq   -> bf16 (rows, 128), cols [32:128] are 0
         kv = fg @ Wkv_p + bkv  -> bf16 (rows, 128), [0:32]=k, [32:64]=v, rest 0
         pm = (init != 0)       -> bf16 0/1 (rows, 256)  (mask from f32 init)
    """
    fg_bf = fg_ref[...].astype(jnp.bfloat16)
    q = jnp.dot(fg_bf, wq_ref[...], preferred_element_type=jnp.float32) + bq_ref[...]
    kv = jnp.dot(fg_bf, wkv_ref[...], preferred_element_type=jnp.float32) + bkv_ref[...]
    q_out_ref[...] = q.astype(jnp.bfloat16)
    kv_out_ref[...] = kv.astype(jnp.bfloat16)
    pm_out_ref[...] = jnp.where(init_ref[...] != 0.0, 1.0, 0.0).astype(jnp.bfloat16)


def _attn_flash_kernel(q_ref, fg_ref, pm_q_ref, kv_ref, pm_a_ref,
                       wd_ref, bd_ref, ln_w_ref, ln_b_ref,
                       o_ref, m_sc, l_sc, acc_sc):
    """Flash-style attention over key tiles (grid axis 1, 'arbitrary').

    Layout tricks (weights zero-padded host-side):
      q @ kv^T           == q.k^T       (zero q-lanes null the v columns)
      (p @ kv) @ Wd_p    == (p @ v) @ Wd^T (Wd_p nonzero only on the v rows)
    """
    j = pl.program_id(1)

    @pl.when(j == 0)
    def _():
        m_sc[...] = jnp.full_like(m_sc, -jnp.inf)
        l_sc[...] = jnp.zeros_like(l_sc)
        acc_sc[...] = jnp.zeros_like(acc_sc)

    q = q_ref[...]                                     # bf16 (tq, 128)
    kv = kv_ref[...]                                   # bf16 (tk, 128)

    # 0/1 entries are exact in bf16; f32 accumulation keeps the dot exact.
    mask = lax.dot_general(pm_q_ref[...], pm_a_ref[...],
                           (((1,), (1,)), ((), ())),
                           preferred_element_type=jnp.float32)       # (tq, tk)
    s = lax.dot_general(q, kv, (((1,), (1,)), ((), ())),
                        preferred_element_type=jnp.float32)
    s = s * jnp.float32(1.0 / math.sqrt(ATTN_DIM))
    s = jnp.where(mask < 0.5, jnp.float32(-1e9), s)

    m_prev = m_sc[...]
    m_new = jnp.maximum(m_prev, jnp.max(s, axis=-1, keepdims=True))
    alpha = jnp.exp(m_prev - m_new)
    p = jnp.exp(s - m_new)
    l_sc[...] = alpha * l_sc[...] + jnp.sum(p, axis=-1, keepdims=True)
    acc_sc[...] = alpha * acc_sc[...] + jnp.dot(p.astype(jnp.bfloat16), kv,
                                                preferred_element_type=jnp.float32)
    m_sc[...] = m_new

    @pl.when(j == pl.num_programs(1) - 1)
    def _():
        # approx reciprocal on the softmax denom: ~1e-3 rel err, fine at 2e-2 tol
        x = acc_sc[...] * pl.reciprocal(l_sc[...], approx=True)       # (tq, 128)
        h = jnp.dot(x.astype(jnp.bfloat16), wd_ref[...],
                    preferred_element_type=jnp.float32) + bd_ref[...]  # (tq, FGP)
        # nn.Dropout(0.1) -> identity in eval mode
        h = h + fg_ref[...]
        # LayerNorm(133, eps=1e-6): padded columns of h are exactly 0, so the
        # sum over the padded width / FG_DIM is the real mean; variance uses the
        # two-pass (h - mean)^2 form restricted to the real columns.
        inv_n = jnp.float32(1.0 / FG_DIM)
        mean = jnp.sum(h, axis=-1, keepdims=True) * inv_n
        col_ok = lax.broadcasted_iota(jnp.int32, h.shape, 1) < FG_DIM
        hc = jnp.where(col_ok, h - mean, jnp.float32(0.0))
        var = jnp.sum(hc * hc, axis=-1, keepdims=True) * inv_n
        hn = hc * lax.rsqrt(var + jnp.float32(1e-6))
        o_ref[...] = hn * ln_w_ref[...] + ln_b_ref[...]


# ----------------------------------------------------------------------------
# Wrappers
# ----------------------------------------------------------------------------
def linear_pallas(x, w_p, b_p):
    """y = x @ W_p + b_p.

    x:   (M, K) f32 (unpadded rows; K zero-padded + bf16-cast here)
    w_p: (K_pad, N_pad) bf16, zero-padded, pre-transposed
    b_p: (1, N_pad) f32, zero-padded
    returns (M, N_pad) f32 (caller slices the real output columns).
    """
    M, K = x.shape
    K_pad, N_pad = w_p.shape
    assert K <= K_pad

    # pre-cast activations to bf16 (halves activation DMA); pad only K axis.
    x_p = _pad_to(x, (M, K_pad)).astype(jnp.bfloat16)

    tm = min(512, _round_up(max(M, 1), 16))          # big M tiles: less W re-streaming
    if N_pad <= 512:
        tn = N_pad
    elif N_pad % 512 == 0:
        tn = 512
    elif N_pad % 256 == 0:
        tn = 256                                      # keep >=256 for v6e/v7x MXU
    else:
        tn = 128
    tk = math.gcd(K_pad, 512)
    grid = (pl.cdiv(M, tm), N_pad // tn, K_pad // tk)
    # TODO(synk): on v7x (64 MiB VMEM) halve tk/tn if K_pad*tn grows large.

    flops = 2 * M * K_pad * N_pad
    bytes_accessed = int(x_p.size) * 2 + int(w_p.size) * 2 \
        + int(b_p.size) * 4 + M * N_pad * 4

    return pl.pallas_call(
        _linear_kernel,
        out_shape=jax.ShapeDtypeStruct((M, N_pad), jnp.float32),
        grid=grid,
        in_specs=[
            pl.BlockSpec((tm, tk), lambda i, j, k: (i, k)),
            pl.BlockSpec((tk, tn), lambda i, j, k: (k, j)),
            pl.BlockSpec((1, tn), lambda i, j, k: (0, j)),
        ],
        out_specs=pl.BlockSpec((tm, tn), lambda i, j, k: (i, j)),
        scratch_shapes=[pltpu.VMEM((tm, tn), jnp.float32)],
        compiler_params=pltpu.CompilerParams(
            dimension_semantics=("parallel", "parallel", "arbitrary")),
        cost_estimate=pl.CostEstimate(flops=int(flops), transcendentals=0,
                                      bytes_accessed=int(bytes_accessed)),
    )(x_p, w_p, b_p)


def attention_layer_pallas(p, fg_hiddens, init_hiddens):
    """AttentionLayer.forward (eval mode) = prologue + flash main kernel."""
    S = fg_hiddens.shape[0]
    S_pad = _round_up(max(S, 1), LANE)
    fg_p = _pad_to(fg_hiddens, (S_pad, FGP))          # f32 (residual precision)
    init_p = _pad_to(init_hiddens, (S_pad, FGP))      # f32 (mask from f32 values)
    # Padded rows: pm row all zero -> those keys are masked out for real queries.
    # TODO(synk): a real row whose init row is entirely zero softmaxes uniformly
    # over S_pad keys here vs S keys in the reference (degenerate edge case).

    tr = math.gcd(S_pad, 512)
    q_all, kv_all, pm_all = pl.pallas_call(
        _attn_prologue_kernel,
        out_shape=(jax.ShapeDtypeStruct((S_pad, ATTN_PAD), jnp.bfloat16),
                   jax.ShapeDtypeStruct((S_pad, ATTN_PAD), jnp.bfloat16),
                   jax.ShapeDtypeStruct((S_pad, FGP), jnp.bfloat16)),
        grid=(S_pad // tr,),
        in_specs=[
            pl.BlockSpec((tr, FGP), lambda i: (i, 0)),
            pl.BlockSpec((tr, FGP), lambda i: (i, 0)),
            pl.BlockSpec(p["wq_p"].shape, lambda i: (0, 0)),
            pl.BlockSpec(p["bq_p"].shape, lambda i: (0, 0)),
            pl.BlockSpec(p["wkv_p"].shape, lambda i: (0, 0)),
            pl.BlockSpec(p["bkv_p"].shape, lambda i: (0, 0)),
        ],
        out_specs=(pl.BlockSpec((tr, ATTN_PAD), lambda i: (i, 0)),
                   pl.BlockSpec((tr, ATTN_PAD), lambda i: (i, 0)),
                   pl.BlockSpec((tr, FGP), lambda i: (i, 0))),
        compiler_params=pltpu.CompilerParams(dimension_semantics=("parallel",)),
        cost_estimate=pl.CostEstimate(
            flops=int(4 * S_pad * FGP * ATTN_PAD),
            transcendentals=0,
            bytes_accessed=int(2 * S_pad * FGP * 4 + S_pad * (2 * ATTN_PAD + FGP) * 2
                               + 2 * FGP * ATTN_PAD * 2)),
    )(fg_p, init_p, p["wq_p"], p["bq_p"], p["wkv_p"], p["bkv_p"])

    tq = min(128, S_pad)
    tk = math.gcd(S_pad, 512)
    nq, nk = S_pad // tq, S_pad // tk

    per_step_flops = 2 * tq * tk * (FGP + 2 * ATTN_PAD)
    epilogue_flops = 2 * tq * ATTN_PAD * FGP
    flops = per_step_flops * nq * nk + epilogue_flops * nq
    transcendentals = nq * nk * (tq * tk + tq) + nq * tq
    bytes_accessed = (nq * (tq * FGP * 4 + tq * FGP * 2 + tq * ATTN_PAD * 2)
                      + nq * nk * (tk * ATTN_PAD * 2 + tk * FGP * 2)
                      + ATTN_PAD * FGP * 2 + 3 * FGP * 4 + S_pad * FGP * 4)

    out = pl.pallas_call(
        _attn_flash_kernel,
        out_shape=jax.ShapeDtypeStruct((S_pad, FGP), jnp.float32),
        grid=(nq, nk),
        in_specs=[
            pl.BlockSpec((tq, ATTN_PAD), lambda i, j: (i, 0)),   # q (query tile)
            pl.BlockSpec((tq, FGP), lambda i, j: (i, 0)),        # fg (residual)
            pl.BlockSpec((tq, FGP), lambda i, j: (i, 0)),        # pm (query rows)
            pl.BlockSpec((tk, ATTN_PAD), lambda i, j: (j, 0)),   # kv (key tile)
            pl.BlockSpec((tk, FGP), lambda i, j: (j, 0)),        # pm (key rows)
            pl.BlockSpec(p["wd_p"].shape, lambda i, j: (0, 0)),
            pl.BlockSpec(p["bd_p"].shape, lambda i, j: (0, 0)),
            pl.BlockSpec(p["ln_w_p"].shape, lambda i, j: (0, 0)),
            pl.BlockSpec(p["ln_b_p"].shape, lambda i, j: (0, 0)),
        ],
        out_specs=pl.BlockSpec((tq, FGP), lambda i, j: (i, 0)),
        scratch_shapes=[pltpu.VMEM((tq, 1), jnp.float32),
                        pltpu.VMEM((tq, 1), jnp.float32),
                        pltpu.VMEM((tq, ATTN_PAD), jnp.float32)],
        compiler_params=pltpu.CompilerParams(
            dimension_semantics=("parallel", "arbitrary")),
        cost_estimate=pl.CostEstimate(flops=int(flops),
                                      transcendentals=int(transcendentals),
                                      bytes_accessed=int(bytes_accessed)),
    )(q_all, fg_p, pm_all, kv_all, pm_all,
      p["wd_p"], p["bd_p"], p["ln_w_p"], p["ln_b_p"])
    return out[:S, :FG_DIM]


# ----------------------------------------------------------------------------
# Parameter construction (deterministic; mirrors the PyTorch __init__ shapes;
# matmul weights rounded to bf16 and zero-padded to lane-dense shapes).
# ----------------------------------------------------------------------------
def _linear_wb(key, d_in, d_out):
    kw, kb = jax.random.split(key)
    scale = 1.0 / math.sqrt(d_in)
    w_t = jax.random.uniform(kw, (d_in, d_out), jnp.float32, -scale, scale)
    b = jax.random.uniform(kb, (1, d_out), jnp.float32, -scale, scale)
    return w_t, b


def _attention_layer_params(key):
    ks = jax.random.split(key, 4)
    wq_t, bq = _linear_wb(ks[0], FG_DIM, ATTN_DIM)
    wk_t, bk = _linear_wb(ks[1], FG_DIM, ATTN_DIM)
    wv_t, bv = _linear_wb(ks[2], FG_DIM, ATTN_DIM)
    wd_t, bd = _linear_wb(ks[3], ATTN_DIM, FG_DIM)

    wq_p = jnp.zeros((FGP, ATTN_PAD), jnp.bfloat16).at[:FG_DIM, :ATTN_DIM].set(
        wq_t.astype(jnp.bfloat16))
    bq_p = jnp.zeros((1, ATTN_PAD), jnp.float32).at[:, :ATTN_DIM].set(bq)
    # fused K|V projection: cols [0:32]=Wk, [32:64]=Wv, rest zero
    wkv_p = (jnp.zeros((FGP, ATTN_PAD), jnp.bfloat16)
             .at[:FG_DIM, :ATTN_DIM].set(wk_t.astype(jnp.bfloat16))
             .at[:FG_DIM, ATTN_DIM:2 * ATTN_DIM].set(wv_t.astype(jnp.bfloat16)))
    bkv_p = (jnp.zeros((1, ATTN_PAD), jnp.float32)
             .at[:, :ATTN_DIM].set(bk)
             .at[:, ATTN_DIM:2 * ATTN_DIM].set(bv))
    # dense weight placed on the v rows of the fused kv layout, rest zero
    wd_p = jnp.zeros((ATTN_PAD, FGP), jnp.bfloat16).at[
        ATTN_DIM:2 * ATTN_DIM, :FG_DIM].set(wd_t.astype(jnp.bfloat16))
    bd_p = jnp.zeros((1, FGP), jnp.float32).at[:, :FG_DIM].set(bd)
    ln_w_p = jnp.zeros((1, FGP), jnp.float32).at[:, :FG_DIM].set(
        jnp.ones((1, FG_DIM), jnp.float32))
    ln_b_p = jnp.zeros((1, FGP), jnp.float32)

    return dict(wq_p=wq_p, bq_p=bq_p, wkv_p=wkv_p, bkv_p=bkv_p,
                wd_p=wd_p, bd_p=bd_p, ln_w_p=ln_w_p, ln_b_p=ln_b_p)


def init_params(key, hidden_size):
    ks = jax.random.split(key, 5)
    HP = _round_up(hidden_size, LANE)

    so_w_t, so_b = _linear_wb(ks[0], hidden_size, hidden_size)
    so_w_p = jnp.zeros((HP, HP), jnp.bfloat16).at[
        :hidden_size, :hidden_size].set(so_w_t.astype(jnp.bfloat16))
    so_b_p = jnp.zeros((1, HP), jnp.float32).at[:, :hidden_size].set(so_b)

    lin_w_t, lin_b = _linear_wb(ks[1], FG_DIM, hidden_size)
    lin_w_p = jnp.zeros((FGP, HP), jnp.bfloat16).at[
        :FG_DIM, :hidden_size].set(lin_w_t.astype(jnp.bfloat16))
    lin_b_p = jnp.zeros((1, HP), jnp.float32).at[:, :hidden_size].set(lin_b)

    return dict(
        hidden_size=hidden_size,
        # Prompt_generator params (constructed, unused by this forward)
        alpha=jnp.full((1,), 0.1, jnp.float32),
        cls=jax.random.normal(ks[2], (1, FG_DIM), jnp.float32),
        linear=dict(w_p=lin_w_p, b_p=lin_b_p),
        attn1=_attention_layer_params(ks[3]),
        attn2=_attention_layer_params(ks[4]),
        norm=dict(w=jnp.ones((1, hidden_size), jnp.float32),
                  b=jnp.zeros((1, hidden_size), jnp.float32)),
        # injected self_output (assumed Linear(hidden_size, hidden_size))
        self_out=dict(w_p=so_w_p, b_p=so_b_p),
    )


def prompt_generator_output_forward(params, hidden_states):
    """== PromptGeneratorOutput.forward: hidden_states = self_out(hidden_states)."""
    h = params["hidden_size"]
    out = linear_pallas(hidden_states, params["self_out"]["w_p"],
                        params["self_out"]["b_p"])
    return out[:, :h]


# ----------------------------------------------------------------------------
# numpy (float64) references for validation
# ----------------------------------------------------------------------------
def _f64(a):
    return np.asarray(jnp.asarray(a, jnp.float32), np.float64)


def _attention_layer_ref_np(p, fg, init):
    fg = np.asarray(fg, np.float64)
    init = np.asarray(init, np.float64)
    wq = _f64(p["wq_p"])[:FG_DIM, :ATTN_DIM]
    bq = _f64(p["bq_p"])[:, :ATTN_DIM]
    wk = _f64(p["wkv_p"])[:FG_DIM, :ATTN_DIM]
    bk = _f64(p["bkv_p"])[:, :ATTN_DIM]
    wv = _f64(p["wkv_p"])[:FG_DIM, ATTN_DIM:2 * ATTN_DIM]
    bv = _f64(p["bkv_p"])[:, ATTN_DIM:2 * ATTN_DIM]
    wd = _f64(p["wd_p"])[ATTN_DIM:2 * ATTN_DIM, :FG_DIM]
    bd = _f64(p["bd_p"])[:, :FG_DIM]
    ln_w = _f64(p["ln_w_p"])[:, :FG_DIM]
    ln_b = _f64(p["ln_b_p"])[:, :FG_DIM]

    q = fg @ wq + bq
    k = fg @ wk + bk
    v = fg @ wv + bv
    pm = (init != 0).astype(np.float64)
    mask = pm @ pm.T
    scores = q @ k.T / math.sqrt(ATTN_DIM)
    scores = np.where(mask == 0, -1e9, scores)
    scores = scores - scores.max(-1, keepdims=True)
    pa = np.exp(scores)
    pa = pa / pa.sum(-1, keepdims=True)
    h = pa @ v @ wd + bd + fg
    mean = h.mean(-1, keepdims=True)
    var = ((h - mean) ** 2).mean(-1, keepdims=True)
    return (h - mean) / np.sqrt(var + 1e-6) * ln_w + ln_b


if __name__ == "__main__":
    hidden_size = 32
    n_atoms = 8   # rows of hidden_states
    n_fg = 8      # rows of fg_states

    root = jax.random.PRNGKey(0)
    k_param, k_h, k_fg = jax.random.split(root, 3)
    params = init_params(k_param, hidden_size)

    hidden_states = jax.random.normal(k_h, (n_atoms, hidden_size), jnp.float32)
    fg_states = jax.random.normal(k_fg, (n_fg, FG_DIM), jnp.float32)

    # --- the actual PromptGeneratorOutput forward pass (Pallas linear) ---
    out = prompt_generator_output_forward(params, hidden_states)
    out = jax.block_until_ready(out)

    # reference computed from the bf16-rounded operands the kernel consumes
    x_ref = np.asarray(hidden_states.astype(jnp.bfloat16).astype(jnp.float32),
                       np.float64)
    w_ref = _f64(params["self_out"]["w_p"])[:hidden_size, :hidden_size]
    b_ref = _f64(params["self_out"]["b_p"])[:, :hidden_size]
    ref_out = x_ref @ w_ref + b_ref
    assert np.allclose(np.asarray(out, np.float64), ref_out, atol=2e-2, rtol=2e-2)

    # --- exercise the AttentionLayer kernels (dead in this forward, but part
    #     of the module's __init__; run once as a sanity check) ---
    attn_out = attention_layer_pallas(params["attn1"], fg_states, fg_states)
    attn_out = jax.block_until_ready(attn_out)
    attn_ref = _attention_layer_ref_np(params["attn1"], fg_states, fg_states)
    assert np.allclose(np.asarray(attn_out, np.float64), attn_ref,
                       atol=2e-2, rtol=2e-2)

    # TODO(synk): Prompt_generator.forward (scatter_/gather/repeat_interleave
    # path) is never invoked by PromptGeneratorOutput.forward and is not
    # implemented here.
    print("KERNEL_OK")
</pallas_src>

<mosaic_0001>
module attributes {stable_mosaic.version = 11 : i64} {
  func.func @_linear_kernel(%arg0: i32, %arg1: i32, %arg2: i32, %arg3: memref<16x128xbf16, #tpu.memory_space<vmem>>, %arg4: memref<128x128xbf16, #tpu.memory_space<vmem>>, %arg5: memref<1x128xf32, #tpu.memory_space<vmem>>, %arg6: memref<16x128xf32, #tpu.memory_space<vmem>>, %arg7: memref<16x128xf32, #tpu.memory_space<vmem>>) attributes {dimension_semantics = [#tpu.dimension_semantics<parallel>, #tpu.dimension_semantics<parallel>, #tpu.dimension_semantics<arbitrary>], iteration_bounds = array<i64: 1, 1, 1>, scalar_prefetch = 0 : i64, scratch_operands = 1 : i64, tpu.core_type = #tpu.core_type<tc>, window_params = [{transform_indices = @transform_0, window_bounds = array<i64: 16, 128>}, {transform_indices = @transform_1, window_bounds = array<i64: 128, 128>}, {transform_indices = @transform_2, window_bounds = array<i64: 1, 128>}, {transform_indices = @transform_3, window_bounds = array<i64: 16, 128>}]} {
    %c0_i32 = arith.constant 0 : i32
    %0 = arith.cmpi eq, %arg2, %c0_i32 : i32
    %1 = arith.extui %0 : i1 to i32
    %c0_i32_0 = arith.constant 0 : i32
    %2 = arith.cmpi ne, %1, %c0_i32_0 : i32
    scf.if %2 {
      %cst_10 = arith.constant 0.000000e+00 : f32
      %12 = vector.broadcast %cst_10 : f32 to vector<16x128xf32>
      %c0_11 = arith.constant 0 : index
      %c0_12 = arith.constant 0 : index
      %13 = vector.load %arg7[%c0_11, %c0_12] : memref<16x128xf32, #tpu.memory_space<vmem>>, vector<16x128xf32>
      tpu.vector_store %arg7[%c0_11, %c0_12], %12 {strides = array<i32>} : memref<16x128xf32, #tpu.memory_space<vmem>>, vector<16x128xf32>,
    } else {
    }
    %c0 = arith.constant 0 : index
    %c0_1 = arith.constant 0 : index
    %3 = vector.load %arg7[%c0, %c0_1] : memref<16x128xf32, #tpu.memory_space<vmem>>, vector<16x128xf32>
    %c0_2 = arith.constant 0 : index
    %c0_3 = arith.constant 0 : index
    %4 = vector.load %arg3[%c0_2, %c0_3] : memref<16x128xbf16, #tpu.memory_space<vmem>>, vector<16x128xbf16>
    %c0_4 = arith.constant 0 : index
    %c0_5 = arith.constant 0 : index
    %5 = vector.load %arg4[%c0_4, %c0_5] : memref<128x128xbf16, #tpu.memory_space<vmem>>, vector<128x128xbf16>
    %cst = arith.constant dense<0.000000e+00> : vector<16x128xf32>
    %6 = tpu.matmul %4, %5, %cst {dimension_numbers = #tpu.dot_dimension_numbers<[1], [0], [0], [1], [0, 0, 1, 1], [], []>} : vector<16x128xbf16>, vector<128x128xbf16>, vector<16x128xf32> -> vector<16x128xf32>
    %7 = arith.addf %3, %6 : vector<16x128xf32>
    %c0_6 = arith.constant 0 : index
    %c0_7 = arith.constant 0 : index
    %8 = vector.load %arg7[%c0_6, %c0_7] : memref<16x128xf32, #tpu.memory_space<vmem>>, vector<16x128xf32>
    tpu.vector_store %arg7[%c0_6, %c0_7], %7 {strides = array<i32>} : memref<16x128xf32, #tpu.memory_space<vmem>>, vector<16x128xf32>,
    %c0_i32_8 = arith.constant 0 : i32
    %9 = arith.cmpi eq, %arg2, %c0_i32_8 : i32
    %10 = arith.extui %9 : i1 to i32
    %c0_i32_9 = arith.constant 0 : i32
    %11 = arith.cmpi ne, %10, %c0_i32_9 : i32
    scf.if %11 {
      %c0_10 = arith.constant 0 : index
      %c0_11 = arith.constant 0 : index
      %12 = vector.load %arg7[%c0_10, %c0_11] : memref<16x128xf32, #tpu.memory_space<vmem>>, vector<16x128xf32>
      %c0_12 = arith.constant 0 : index
      %c0_13 = arith.constant 0 : index
      %13 = vector.load %arg5[%c0_12, %c0_13] : memref<1x128xf32, #tpu.memory_space<vmem>>, vector<1x128xf32>
      %14 = vector.broadcast %13 : vector<1x128xf32> to vector<16x128xf32>
      %15 = arith.addf %12, %14 : vector<16x128xf32>
      %c0_14 = arith.constant 0 : index
      %c0_15 = arith.constant 0 : index
      %16 = vector.load %arg6[%c0_14, %c0_15] : memref<16x128xf32, #tpu.memory_space<vmem>>, vector<16x128xf32>
      tpu.vector_store %arg6[%c0_14, %c0_15], %15 {strides = array<i32>} : memref<16x128xf32, #tpu.memory_space<vmem>>, vector<16x128xf32>,
    } else {
    }
    return
  }
  func.func @transform_0(%arg0: i32, %arg1: i32, %arg2: i32) -> (i32, i32) {
    %c0_i32 = arith.constant 0 : i32
    return %arg0, %arg2 : i32, i32
  }
  func.func @transform_1(%arg0: i32, %arg1: i32, %arg2: i32) -> (i32, i32) {
    %c0_i32 = arith.constant 0 : i32
    return %arg2, %arg1 : i32, i32
  }
  func.func @transform_2(%arg0: i32, %arg1: i32, %arg2: i32) -> (i32, i32) {
    %c0_i32 = arith.constant 0 : i32
    %c0_i32_0 = arith.constant 0 : i32
    return %c0_i32, %arg1 : i32, i32
  }
  func.func @transform_3(%arg0: i32, %arg1: i32, %arg2: i32) -> (i32, i32) {
    %c0_i32 = arith.constant 0 : i32
    return %arg0, %arg1 : i32, i32
  }
}

</mosaic_0001>

<bundles_post_ra>
// kernel: tpu_custom_call.1
= control target key start
LH: loop header
LB: loop body
LE: loop exit
PB: predicated region body
PF: predicated region fallthrough
CT: control target
= control target key end

     0   :  { %8 = vsyncpa [#allocation4], 0  ;;  %s400_s0 = inlined_call_operand.hbm [shape: bf16[8,128], index: 0, kind: input, shape index: {}]   ;;  %s401_s1 = inlined_call_operand.hbm [shape: bf16[128,128], index: 1, kind: input, shape index: {}]   ;;  %s402_s2 = inlined_call_operand.vmem [shape: f32[1,128], index: 2, kind: input, shape index: {}]   ;;  %s403_s3 = inlined_call_operand.hbm [shape: f32[8,128], index: 3, kind: output, shape index: {}]  }
   0x1   :  { %9 = vsyncpa [#allocation7], 0 }
   0x2   :  { %10 = vsyncpa [#allocation5], 0 }
   0x3   :  { %15 = vsyncadd [#allocation4], 64  ;;  %s332_s12 = smov [#allocation3]   ;;  %s260_s16 = scalar_lea.hbm %s400_s0, 64 }
   0x4   :  { %s16_s13 = sshll.u32 %s332_s12, 4  ;;  %p261_p0 = scmp.ne.s32.totalorder %s400_s0, %s260_s16  ;;  %s17_s13 = int_to_ptr.vmem [resolvable:$true] %s16_s13 }
   0x5   :  { %p264_p1 = scmp.lt.u32.totalorder %s260_s16, %s400_s0 }
   0x7   :  { %p266_p2 = pnand %p264_p1, %p261_p0 }
   0x9   :  { %269 = shalt.err (!%p266_p2)
}
   0xa   :  { %s270_s21 = scalar_lea.vmem %s17_s13, 64  ;;  %s274_s22 = scalar_lea.vmem %s17_s13, 128 }
   0xb   :  { %p271_p3 = scmp.ne.s32.totalorder %s17_s13, %s270_s21  ;;  %p275_p4 = scmp.lt.s32.totalorder %s17_s13, %s17_s13 }
   0xc   :  { %p276_p5 = scmp.lt.s32.totalorder %s274_s22, %s270_s21 }
   0xe   :  { %p277_p6 = por %p276_p5, %p275_p4 }
  0x10   :  { %p278_p7 = pnand %p277_p6, %p271_p3 }
  0x12   :  { %281 = shalt.err (!%p278_p7)
}
  0x13   :  { %s333_s23 = smov 64   ;;  %s334_s24 = smov 4  }
  0x14   :  { %22 = dma.hbm_to_vmem [thread:$0]  %s400_s0, 64, %s17_s13, [#allocation4], %s333_s23, %s333_s23, %s334_s24  }
  0x15   :  { %s335_s27 = smov [#allocation6]   ;;  %s282_s4 = scalar_lea.hbm %s401_s1, 1024 }
  0x16   :  { %s28_s28 = sshll.u32 %s335_s27, 4  ;;  %p283_p8 = scmp.ne.s32.totalorder %s401_s1, %s282_s4  ;;  %s29_s28 = int_to_ptr.vmem [resolvable:$true] %s28_s28 }
  0x17   :  { %p286_p9 = scmp.lt.u32.totalorder %s282_s4, %s401_s1 }
  0x19   :  { %p288_p10 = pnand %p286_p9, %p283_p8 }
  0x1b   :  { %291 = shalt.err (!%p288_p10)
}
  0x1c   :  { %s292_s9 = scalar_lea.vmem %s29_s28, 1024  ;;  %p297_p12 = scmp.lt.s32.totalorder %s29_s28, %s29_s28 }
  0x1d   :  { %p293_p11 = scmp.ne.s32.totalorder %s29_s28, %s292_s9  ;;  %p298_p13 = scmp.lt.s32.totalorder %s292_s9, %s292_s9 }
  0x1f   :  { %p299_p0 = por %p298_p13, %p297_p12 }
  0x21   :  { %p300_p1 = pnand %p299_p0, %p293_p11 }
  0x23   :  { %303 = shalt.err (!%p300_p1)
}
  0x24   :  { %34 = dma.hbm_to_vmem [thread:$0]  %s401_s1, 1024, %s29_s28, [#allocation7], %s333_s23, %s333_s23, %s334_s24  }
  0x25   :  { %326 = dma.done.wait [#allocation4], 128  }
  0x26   :  { %327 = vsyncadd [#allocation4], 4294967168 }
  0x27   :  { %328 = dma.done.wait [#allocation7], 1024  }
  0x28   :  { %329 = vsyncadd [#allocation7], 4294966272  ;;  %v336_v0 = vmov 0.0   ;;  %vm337_vm0 = vmmov 0   ;;  %v251_v1 = vld [vmem:[#allocation6] sm:$0xff]   ;;  %v252_v2 = vld [vmem:[#allocation6 + $0x8] sm:$0xff]  }
  0x29   :  { %222 = vmatprep.subr.bf16.mxu0 %v336_v0  ;;  %238 = vmatprep.mubr.msk.bf16.mxu0 %vm337_vm0, %v336_v0  ;;  %v253_v3 = vld [vmem:[#allocation6 + $0x10] sm:$0xff]   ;;  %v254_v4 = vld [vmem:[#allocation6 + $0x18] sm:$0xff]   ;;  %v255_v5 = vld [vmem:[#allocation6 + $0x20] sm:$0xff]  }
  0x2a   :  { %223 = vmatpush3.bf16.msra.mxu0 %v251_v1  ;;  %v256_v6 = vld [vmem:[#allocation6 + $0x28] sm:$0xff]   ;;  %v257_v7 = vld [vmem:[#allocation6 + $0x30] sm:$0xff]   ;;  %v258_v8 = vld [vmem:[#allocation6 + $0x38] sm:$0xff]  }
  0x2b   :  { %224 = vmatprep.subr.bf16.mxu0 %v336_v0  ;;  %v259_v9 = vld [vmem:[#allocation3] sm:$0xff]  }
  0x2c   :  { %v212_v10 = vld [vmem:[%s402_s2] ss:$0 sm:$0xff] }
  0x2e   :  { %225 = vmatpush3.bf16.msra.mxu0 %v252_v2 }
  0x2f   :  { %226 = vmatprep.subr.bf16.mxu0 %v336_v0 }
  0x32   :  { %227 = vmatpush3.bf16.msra.mxu0 %v253_v3 }
  0x33   :  { %228 = vmatprep.subr.bf16.mxu0 %v336_v0 }
  0x36   :  { %229 = vmatpush3.bf16.msra.mxu0 %v254_v4 }
  0x37   :  { %230 = vmatprep.subr.bf16.mxu0 %v336_v0 }
  0x3a   :  { %231 = vmatpush3.bf16.msra.mxu0 %v255_v5 }
  0x3b   :  { %232 = vmatprep.subr.bf16.mxu0 %v336_v0 }
  0x3e   :  { %233 = vmatpush3.bf16.msra.mxu0 %v256_v6 }
  0x3f   :  { %234 = vmatprep.subr.bf16.mxu0 %v336_v0 }
  0x42   :  { %235 = vmatpush3.bf16.msra.mxu0 %v257_v7 }
  0x43   :  { %236 = vmatprep.subr.bf16.mxu0 %v336_v0 }
  0x46   :  { %237 = vmatpush3.bf16.msra.mxu0 %v258_v8 }
  0x49   :  { %239 = vmatmul.mubr.bf16.vlgmr.msra.gmra.mrb[0].mxu0 %v259_v9 }
 0x11c   :  { %v158_v11 = vpop.f32.mrb[0].mxu0 }
 0x11d   :  { %v181_v12 = vadd.f32 %v212_v10, %v158_v11  ;;  %v240_v13 = vpop.f32.mrb[1].mxu0 }
 0x11e   :  { %v161_v14 = vpop.f32.mrb[2].mxu0 }
 0x11f   :  { %183 = vst [vmem:[#allocation8] sm:$0xff] %v181_v12  ;;  %v182_v15 = vadd.f32 %v212_v10, %v161_v14  ;;  %v241_v16 = vpop.f32.mrb[3].mxu0 }
 0x121   :  { %184 = vst [vmem:[#allocation8 + $0x8] sm:$0xff] %v182_v15 }
 0x122   :  { %189 = vsyncadd [#allocation5], 128  ;;  %s338_s12 = smov [#allocation8]  }
 0x123   :  { %s190_s13 = sshll.u32 %s338_s12, 4  ;;  %s191_s13 = int_to_ptr.vmem [resolvable:$true] %s190_s13 }
 0x124   :  { %s304_s14 = scalar_lea.vmem %s191_s13, 128  ;;  %s308_s15 = scalar_lea.vmem %s191_s13, 256 }
 0x125   :  { %p305_p2 = scmp.ne.s32.totalorder %s191_s13, %s304_s14  ;;  %p309_p3 = scmp.lt.s32.totalorder %s191_s13, %s191_s13 }
 0x126   :  { %p310_p4 = scmp.lt.s32.totalorder %s308_s15, %s304_s14 }
 0x128   :  { %p311_p5 = por %p310_p4, %p309_p3 }
 0x12a   :  { %p312_p6 = pnand %p311_p5, %p305_p2 }
 0x12c   :  { %315 = shalt.err (!%p312_p6)
}
 0x12d   :  { %s316_s17 = scalar_lea.hbm %s403_s3, 128 }
 0x12e   :  { %p317_p7 = scmp.ne.s32.totalorder %s403_s3, %s316_s17  ;;  %p320_p8 = scmp.lt.u32.totalorder %s316_s17, %s403_s3 }
 0x130   :  { %p322_p9 = pnand %p320_p8, %p317_p7 }
 0x132   :  { %325 = shalt.err (!%p322_p9)
}
 0x133   :  { %s339_s22 = smov 128   ;;  %s340_s23 = smov 8  }
 0x134   :  { %196 = dma.vmem_to_hbm [thread:$0]  %s191_s13, 128, %s403_s3, [#allocation5], %s339_s22, %s339_s22, %s340_s23  }
 0x135   :  { %330 = dma.done.wait [#allocation5], 256  }
 0x136   :  { %331 = vsyncadd [#allocation5], 4294967040 }
 0x137   :  { %200 = vsyncpa [#allocation4], 1 }
 0x138   :  { %201 = vsyncpa [#allocation7], 1 }
 0x139   :  { %202 = vsyncpa [#allocation5], 1 }

</bundles_post_ra>
